<compile_context>
chip_gen: v6e
topology: v6e:2x2x1
jax: 0.10.0
libtpu: 0.0.40
codegen_flags: <defaults>
</compile_context>

<pallas_src>
import functools

import jax
import jax.numpy as jnp
from jax import lax
from jax.experimental import pallas as pl
from jax.experimental.pallas import tpu as pltpu


# ---------------------------------------------------------------------------
# Trace-time helpers
# ---------------------------------------------------------------------------
def _interp_matrix(out_size: int, in_size: int) -> jnp.ndarray:
    """Interpolation matrix matching F.interpolate(mode='bilinear',
    align_corners=False) along one axis. Shape (out_size, in_size), f32."""
    dst = jnp.arange(out_size, dtype=jnp.float32)
    scale = in_size / out_size
    src = (dst + 0.5) * scale - 0.5
    src = jnp.clip(src, 0.0, float(in_size - 1))
    i0 = jnp.clip(jnp.floor(src).astype(jnp.int32), 0, in_size - 1)
    i1 = jnp.clip(i0 + 1, 0, in_size - 1)
    frac = src - i0.astype(jnp.float32)
    rows = jnp.arange(out_size)
    w = jnp.zeros((out_size, in_size), dtype=jnp.float32)
    w = w.at[rows, i0].add(1.0 - frac)
    w = w.at[rows, i1].add(frac)
    return w


def _pad8(n: int) -> int:
    return -(-n // 8) * 8


def _pad128(n: int) -> int:
    return -(-n // 128) * 128


def _hw_config():
    """Return (vmem_limit_bytes, tile_budget_bytes, two_cores)."""
    cap = None
    try:
        cap = int(pltpu.get_tpu_info().vmem_capacity_bytes)
    except Exception:
        cap = None
    kind = ""
    try:
        kind = jax.devices()[0].device_kind.lower()
    except Exception:
        pass
    is_v7 = "v7" in kind
    queried = cap is not None
    if cap is None:
        cap = 64 * 1024 * 1024          # conservative default: v7x per-core VMEM
    if is_v7:
        cap = min(cap, 64 * 1024 * 1024)  # 64 MiB per TensorCore on v7x
    cap = max(cap, 32 * 1024 * 1024)
    # ~96 MiB scoped limit on 128 MiB parts (v5e/v6e), ~48 MiB on v7x.
    limit = max(24 * 1024 * 1024, min(cap * 3 // 4, 100 * 1024 * 1024))
    budget = limit * 4 // 5              # 20% headroom for Mosaic scratch
    two_cores = is_v7 or (queried and cap <= 64 * 1024 * 1024)
    return int(limit), int(budget), two_cores


def _grid_tbc(bc: int, tbc_max, align: int, two_cores: bool) -> int:
    """Channel-block size: as large as the VMEM budget allows; one big step on
    single-core parts, an even number of steps on v7x's two TensorCores."""
    if bc <= align:
        return bc
    tbc_max = max(1, min(int(tbc_max), bc))
    t_best = bc if tbc_max >= bc else max(align, (tbc_max // align) * align)
    if not two_cores:
        return t_best
    steps_best = -(-bc // t_best)
    if steps_best > 1 and steps_best % 2 == 0:
        return t_best
    start = max(2, steps_best + 1 if steps_best % 2 else steps_best)
    for steps in range(start, 2 * steps_best + 3, 2):
        t = -(-bc // steps)
        t = min(-(-t // align) * align, bc)
        if t <= tbc_max and (-(-bc // t)) % 2 == 0:
            return t
    return t_best


# ---------------------------------------------------------------------------
# Kernels
# ---------------------------------------------------------------------------
def _kron_kernel(x_ref, k_ref, o_ref):
    # x_ref: (TBC, h_in*w_in); k_ref: (h_in*w_in, H_out*W_out)
    # o_ref: (TBC, H_out*W_out)  -- lane-dense output slab (unmasked vst).
    x = x_ref[...].astype(k_ref.dtype)          # no-op for f32 / bf16 / f16
    o_ref[...] = jnp.dot(x, k_ref[...],
                         preferred_element_type=jnp.float32).astype(o_ref.dtype)


def _separable_kernel(x_ref, wh_ref, wwt_ref, o_ref, *, unroll):
    # x_ref: (TBC, h_in, w_in); wh_ref: (H_out, h_in); wwt_ref: (w_in, W_out)
    # o_ref: (TBC, H_out, W_out)
    tbc = x_ref.shape[0]
    wh = wh_ref[...]
    wwt = wwt_ref[...]

    def body(t, carry):
        xt = x_ref[t].astype(wwt.dtype)                              # (h_in, w_in)
        yt = jnp.dot(xt, wwt, preferred_element_type=jnp.float32)    # (h_in, W_out)
        ot = jnp.dot(wh, yt.astype(wh.dtype),
                     preferred_element_type=jnp.float32)             # (H_out, W_out)
        o_ref[t] = ot.astype(o_ref.dtype)
        return carry

    lax.fori_loop(0, tbc, body, 0, unroll=unroll)


# ---------------------------------------------------------------------------
# Wrapper
# ---------------------------------------------------------------------------
def bilinear_upsample(feats: jnp.ndarray, img: jnp.ndarray, *,
                      force_path: str | None = None) -> jnp.ndarray:
    """Pallas equivalent of Bilinear().forward(feats, img).

    force_path: None (auto), "kron", or "separable" (testing hook).
    """
    b, c, h_in, w_in = feats.shape
    h_out, w_out = int(img.shape[-2]), int(img.shape[-1])
    bc = b * c
    hw_in, hw_out = h_in * w_in, h_out * w_out

    in_dtype = jnp.dtype(feats.dtype)
    # bf16/f16 feats: keep weights (and the MXU) at the narrow dtype and rely
    # on preferred_element_type=f32 for accumulation -> no in-kernel upcast.
    if in_dtype in (jnp.dtype(jnp.float32), jnp.dtype(jnp.bfloat16),
                    jnp.dtype(jnp.float16)):
        w_dtype = in_dtype
    else:
        w_dtype = jnp.dtype(jnp.float32)
    in_isz = in_dtype.itemsize
    out_isz = in_isz
    w_isz = w_dtype.itemsize
    sub_align = max(8, 32 // in_isz)      # sublane tile: 8 (f32) / 16 (bf16) / 32 (int8)

    wh_f = _interp_matrix(h_out, h_in)    # (H_out, h_in)  f32
    ww_f = _interp_matrix(w_out, w_in)    # (W_out, w_in)  f32

    vmem_limit, budget, two_cores = _hw_config()

    # Kronecker single-matmul path when K fits comfortably in VMEM and the
    # extra FLOPs stay well below the HBM/compute ridge (v5e ~240 fl/B).
    kron_fixed = 2 * w_isz * _pad8(hw_in) * _pad128(hw_out)   # K, double-buffered
    kron_ok = (kron_fixed <= min(8 * 1024 * 1024, budget // 4)
               and 2.0 * hw_in / out_isz <= 192.0)
    use_kron = kron_ok if force_path is None else (force_path == "kron")

    if use_kron:
        # K[(i*w_in + j), (H*W_out + W)] = Wh[H, i] * Ww[W, j]
        kmat = jnp.kron(wh_f.T, ww_f.T).astype(w_dtype)       # (hw_in, hw_out)
        x = feats.reshape(bc, hw_in)

        per_chan = (2 * in_isz * _pad128(hw_in)               # x window (x2 buf)
                    + 2 * out_isz * _pad128(hw_out)           # out window (x2 buf)
                    + (4 * _pad128(hw_out) if out_isz < 4 else 0)   # f32 pre-cast result
                    + (w_isz * _pad128(hw_in) if in_dtype != w_dtype else 0))
        tbc = _grid_tbc(bc, (budget - kron_fixed) // per_chan, sub_align, two_cores)
        grid = (pl.cdiv(bc, tbc),)

        cost = pl.CostEstimate(
            flops=int(2 * bc * hw_in * hw_out),
            transcendentals=0,
            bytes_accessed=int(bc * hw_in * in_isz + bc * hw_out * out_isz
                               + hw_in * hw_out * w_isz))

        out = pl.pallas_call(
            _kron_kernel,
            out_shape=jax.ShapeDtypeStruct((bc, hw_out), in_dtype),
            grid_spec=pltpu.PrefetchScalarGridSpec(
                num_scalar_prefetch=0,
                grid=grid,
                in_specs=[
                    pl.BlockSpec((tbc, hw_in), lambda i: (i, 0)),
                    pl.BlockSpec((hw_in, hw_out), lambda i: (0, 0)),
                ],
                out_specs=pl.BlockSpec((tbc, hw_out), lambda i: (i, 0)),
            ),
            compiler_params=pltpu.CompilerParams(
                dimension_semantics=("parallel",),
                vmem_limit_bytes=int(vmem_limit)),
            cost_estimate=cost,
        )(x, kmat)
        return out.reshape(b, c, h_out, w_out)

    # Separable fallback: W-interp then H-interp per channel slice; Wh is
    # never broadcast per channel, so per-channel VMEM is just I/O windows.
    wh = wh_f.astype(w_dtype)                                 # (H_out, h_in)
    wwt = ww_f.T.astype(w_dtype)                              # (w_in, W_out)
    x = feats.reshape(bc, h_in, w_in)

    per_chan = (2 * in_isz * _pad8(h_in) * _pad128(w_in)
                + 2 * out_isz * _pad8(h_out) * _pad128(w_out))
    fixed = (2 * w_isz * (_pad8(h_out) * _pad128(h_in)
                          + _pad8(w_in) * _pad128(w_out))     # Wh, Ww^T (x2 buf)
             + 8 * 4 * (_pad8(h_in) + _pad8(h_out)) * _pad128(w_out)  # loop temps
             + 2 * 1024 * 1024)                               # Mosaic scratch slack
    tbc = _grid_tbc(bc, (budget - fixed) // per_chan, 1, two_cores)
    grid = (pl.cdiv(bc, tbc),)
    unroll = int(min(tbc, 8))

    cost = pl.CostEstimate(
        flops=int(2 * bc * (hw_in * w_out + h_in * h_out * w_out)),
        transcendentals=0,
        bytes_accessed=int(bc * hw_in * in_isz + bc * hw_out * out_isz
                           + (wh.size + wwt.size) * w_isz))

    out = pl.pallas_call(
        functools.partial(_separable_kernel, unroll=unroll),
        out_shape=jax.ShapeDtypeStruct((bc, h_out, w_out), in_dtype),
        grid_spec=pltpu.PrefetchScalarGridSpec(
            num_scalar_prefetch=0,
            grid=grid,
            in_specs=[
                pl.BlockSpec((tbc, h_in, w_in), lambda i: (i, 0, 0)),
                pl.BlockSpec((h_out, h_in), lambda i: (0, 0)),
                pl.BlockSpec((w_in, w_out), lambda i: (0, 0)),
            ],
            out_specs=pl.BlockSpec((tbc, h_out, w_out), lambda i: (i, 0, 0)),
        ),
        compiler_params=pltpu.CompilerParams(
            dimension_semantics=("parallel",),
            vmem_limit_bytes=int(vmem_limit)),
        cost_estimate=cost,
    )(x, wh, wwt)
    return out.reshape(b, c, h_out, w_out)


if __name__ == "__main__":
    key = jax.random.PRNGKey(0)
    k1, k2 = jax.random.split(key)

    # Low-res features upsampled to the guidance image resolution.
    feats = jax.random.normal(k1, (2, 4, 8, 8), dtype=jnp.float32)    # (B, C, h, w)
    img = jax.random.normal(k2, (2, 3, 16, 16), dtype=jnp.float32)    # (B, 3, H, W)

    # Pure-JAX reference using the same separable formulation.
    wh_ref_mat = _interp_matrix(16, 8)
    ww_ref_mat = _interp_matrix(16, 8)
    ref = jnp.einsum("Hh,bchw,Ww->bcHW", wh_ref_mat, feats, ww_ref_mat)

    # Default (auto) path -- Kronecker single-matmul for these sizes.
    out = jax.block_until_ready(bilinear_upsample(feats, img))
    assert out.shape == (2, 4, 16, 16), out.shape
    assert jnp.allclose(out, ref, atol=1e-5, rtol=1e-5)

    # Separable fallback path, exercised explicitly.
    out_sep = jax.block_until_ready(
        bilinear_upsample(feats, img, force_path="separable"))
    assert jnp.allclose(out_sep, ref, atol=1e-5, rtol=1e-5)

    # bf16 feats: weights stay bf16 (no in-kernel f32 upcast), accumulation f32.
    out_bf = jax.block_until_ready(
        bilinear_upsample(feats.astype(jnp.bfloat16), img))
    assert out_bf.dtype == jnp.bfloat16
    assert jnp.allclose(out_bf.astype(jnp.float32), ref, atol=0.06, rtol=0.06)

    print("KERNEL_OK")
</pallas_src>

<mosaic_0001>
module attributes {stable_mosaic.version = 11 : i64} {
  func.func @_kron_kernel(%arg0: i32, %arg1: memref<8x64xf32, #tpu.memory_space<vmem>>, %arg2: memref<64x256xf32, #tpu.memory_space<vmem>>, %arg3: memref<8x256xf32, #tpu.memory_space<vmem>>) attributes {dimension_semantics = [#tpu.dimension_semantics<parallel>], iteration_bounds = array<i64: 1>, scalar_prefetch = 0 : i64, scratch_operands = 0 : i64, tpu.core_type = #tpu.core_type<tc>, window_params = [{transform_indices = @transform_0, window_bounds = array<i64: 8, 64>}, {pipeline_mode = #tpu.pipeline_mode<synchronous>, transform_indices = @transform_1, window_bounds = array<i64: 64, 256>}, {transform_indices = @transform_2, window_bounds = array<i64: 8, 256>}]} {
    %c0 = arith.constant 0 : index
    %c0_0 = arith.constant 0 : index
    %0 = vector.load %arg1[%c0, %c0_0] : memref<8x64xf32, #tpu.memory_space<vmem>>, vector<8x64xf32>
    %c0_1 = arith.constant 0 : index
    %c0_2 = arith.constant 0 : index
    %1 = vector.load %arg2[%c0_1, %c0_2] : memref<64x256xf32, #tpu.memory_space<vmem>>, vector<64x256xf32>
    %cst = arith.constant dense<0.000000e+00> : vector<8x256xf32>
    %2 = tpu.matmul %0, %1, %cst {dimension_numbers = #tpu.dot_dimension_numbers<[1], [0], [0], [1], [0, 0, 1, 1], [], []>} : vector<8x64xf32>, vector<64x256xf32>, vector<8x256xf32> -> vector<8x256xf32>
    %c0_3 = arith.constant 0 : index
    %c0_4 = arith.constant 0 : index
    %3 = vector.load %arg3[%c0_3, %c0_4] : memref<8x256xf32, #tpu.memory_space<vmem>>, vector<8x256xf32>
    tpu.vector_store %arg3[%c0_3, %c0_4], %2 {strides = array<i32>} : memref<8x256xf32, #tpu.memory_space<vmem>>, vector<8x256xf32>,
    return
  }
  func.func @transform_0(%arg0: i32) -> (i32, i32) {
    %c0_i32 = arith.constant 0 : i32
    %c0_i32_0 = arith.constant 0 : i32
    return %arg0, %c0_i32 : i32, i32
  }
  func.func @transform_1(%arg0: i32) -> (i32, i32) {
    %c0_i32 = arith.constant 0 : i32
    %c0_i32_0 = arith.constant 0 : i32
    %c0_i32_1 = arith.constant 0 : i32
    return %c0_i32, %c0_i32_0 : i32, i32
  }
  func.func @transform_2(%arg0: i32) -> (i32, i32) {
    %c0_i32 = arith.constant 0 : i32
    %c0_i32_0 = arith.constant 0 : i32
    return %arg0, %c0_i32 : i32, i32
  }
}

</mosaic_0001>

<bundles_post_ra>
// kernel: tpu_custom_call.1
= control target key start
LH: loop header
LB: loop body
LE: loop exit
PB: predicated region body
PF: predicated region fallthrough
CT: control target
= control target key end

     0   :  { %7 = vsyncpa [#allocation3], 0  ;;  %s251_s0 = inlined_call_operand.hbm [shape: f32[8,64], index: 0, kind: input, shape index: {}]   ;;  %s252_s1 = inlined_call_operand.hbm [shape: f32[64,256], index: 1, kind: input, shape index: {}]   ;;  %s253_s2 = inlined_call_operand.hbm [shape: f32[8,256], index: 2, kind: output, shape index: {}]  }
   0x1   :  { %8 = vsyncpa [#allocation6], 0 }
   0x2   :  { %9 = vsyncpa [#allocation4], 0  ;;  %s221_s9 = smov [#allocation2]   ;;  %s222_s11 = smov [#allocation5]  }
   0x3   :  { %s16_s10 = sshll.u32 %s221_s9, 4  ;;  %s25_s12 = sshll.u32 %s222_s11, 4  ;;  %s17_s10 = int_to_ptr.vmem [resolvable:$true] %s16_s10  ;;  %s26_s12 = int_to_ptr.vmem [resolvable:$true] %s25_s12 }
   0x4   :  { %s163_s13 = scalar_lea.vmem %s17_s10, 128  ;;  %p168_p1 = scmp.lt.s32.totalorder %s17_s10, %s17_s10 }
   0x5   :  { %p164_p0 = scmp.ne.s32.totalorder %s17_s10, %s163_s13  ;;  %p169_p2 = scmp.lt.s32.totalorder %s163_s13, %s163_s13 }
   0x7   :  { %p170_p3 = por %p169_p2, %p168_p1 }
   0x9   :  { %p171_p4 = pnand %p170_p3, %p164_p0 }
   0xb   :  { %174 = shalt.err (!%p171_p4)
}
   0xc   :  { %19 = dma.hbm_to_vmem [thread:$0]  %s251_s0, 128, %s17_s10, [#allocation3]  }
   0xd   :  { %s183_s16 = scalar_lea.vmem %s26_s12, 2048  ;;  %p188_p6 = scmp.lt.s32.totalorder %s26_s12, %s26_s12 }
   0xe   :  { %p184_p5 = scmp.ne.s32.totalorder %s26_s12, %s183_s16  ;;  %p189_p7 = scmp.lt.s32.totalorder %s183_s16, %s183_s16 }
  0x10   :  { %p190_p8 = por %p189_p7, %p188_p6 }
  0x12   :  { %p191_p9 = pnand %p190_p8, %p184_p5 }
  0x14   :  { %194 = shalt.err (!%p191_p9)
}
  0x15   :  { %s223_s17 = smov 256   ;;  %s224_s18 = smov 16  }
  0x16   :  { %31 = dma.hbm_to_vmem [thread:$0]  %s252_s1, 2048, %s26_s12, [#allocation6], %s223_s17, %s223_s17, %s224_s18  }
  0x17   :  { %215 = dma.done.wait [#allocation3], 128  }
  0x18   :  { %216 = vsyncadd [#allocation3], 4294967168 }
  0x19   :  { %217 = dma.done.wait [#allocation6], 2048  }
  0x1a   :  { %218 = vsyncadd [#allocation6], 4294965248  ;;  %v225_v0 = vmov 0.0   ;;  %v54_v1 = vld [vmem:[#allocation5 + $0x78] sm:$0xff]  ;;  %v53_v2 = vld [vmem:[#allocation5 + $0x70] sm:$0xff]  ;;  %vm55_vm0 = vcmask 523264  }
  0x1b   :  { %123 = vmatprep.mubr.f32.mxu0 %v225_v0  ;;  %v52_v3 = vld [vmem:[#allocation5 + $0x68] sm:$0xff]  ;;  %75 = vmatprep.subr.mxu0 %v54_v1  ;;  %v51_v4 = vld [vmem:[#allocation5 + $0x60] sm:$0xff]  ;;  %v50_v5 = vld [vmem:[#allocation5 + $0x58] sm:$0xff]  ;;  %s226_s0 = smov [#allocation7]  }
  0x1c   :  { %76 = vmatpush1.msra.mxu0 %v53_v2  ;;  %v49_v6 = vld [vmem:[#allocation5 + $0x50] sm:$0xff]  ;;  %v48_v7 = vld [vmem:[#allocation5 + $0x48] sm:$0xff]  ;;  %v47_v8 = vld [vmem:[#allocation5 + $0x40] sm:$0xff]  ;;  %s138_s1 = sshll.u32 %s226_s0, 4  ;;  %s139_s1 = int_to_ptr.vmem [resolvable:$true] %s138_s1 }
  0x1d   :  { %77 = vmatprep.subr.mxu0 %v52_v3  ;;  %v46_v9 = vld [vmem:[#allocation5 + $0x38] sm:$0xff]  ;;  %v45_v10 = vld [vmem:[#allocation5 + $0x30] sm:$0xff]  ;;  %v44_v11 = vld [vmem:[#allocation5 + $0x28] sm:$0xff]  ;;  %s195_s21 = scalar_lea.vmem %s139_s1, 256  ;;  %p200_p11 = scmp.lt.s32.totalorder %s139_s1, %s139_s1 }
  0x1e   :  { %78 = vmatpush1.msra.mxu0 %v51_v4  ;;  %v43_v12 = vld [vmem:[#allocation5 + $0x20] sm:$0xff]  ;;  %v42_v13 = vld [vmem:[#allocation5 + $0x18] sm:$0xff]  ;;  %v41_v14 = vld [vmem:[#allocation5 + $0x10] sm:$0xff]  ;;  %p196_p10 = scmp.ne.s32.totalorder %s139_s1, %s195_s21  ;;  %p201_p12 = scmp.lt.s32.totalorder %s195_s21, %s195_s21 }
  0x1f   :  { %79 = vmatprep.subr.mxu0 %v50_v5  ;;  %v40_v15 = vld [vmem:[#allocation5 + $0x8] sm:$0xff]  ;;  %v39_v16 = vld [vmem:[#allocation5] sm:$0xff]  ;;  %v38_v17 = vld [vmem:[#allocation2] sm:$0xff] }
  0x20   :  { %80 = vmatpush1.msra.mxu0 %v49_v6  ;;  %p202_p13 = por %p201_p12, %p200_p11 }
  0x21   :  { %81 = vmatprep.subr.mxu0 %v48_v7 }
  0x22   :  { %82 = vmatpush1.msra.mxu0 %v47_v8  ;;  %p203_p0 = pnand %p202_p13, %p196_p10 }
  0x23   :  { %83 = vmatprep.subr.mxu0 %v46_v9 }
  0x24   :  { %84 = vmatpush1.msra.mxu0 %v45_v10 }
  0x25   :  { %85 = vmatprep.subr.mxu0 %v44_v11 }
  0x26   :  { %86 = vmatpush1.msra.mxu0 %v43_v12 }
  0x27   :  { %87 = vmatprep.subr.mxu0 %v42_v13 }
  0x28   :  { %88 = vmatpush1.msra.mxu0 %v41_v14 }
  0x29   :  { %89 = vmatprep.subr.mxu0 %v40_v15 }
  0x2a   :  { %90 = vmatpush1.msra.mxu0 %v39_v16 }
  0x2b   :  { %148 = vmatmul.mubr.msk.f32.vlgmr.msra.gmra.mxu0 %vm55_vm0, %v38_v17 }
  0xeb   :  { %v125_v18 = vpop.f32.mrf.mxu0 }
  0xec   :  { %130 = vst [vmem:[#allocation7] sm:$0xff] %v125_v18 }
  0xed   :  { %v127_v19 = vpop.f32.mrf.mxu0 }
  0xee   :  { %131 = vst [vmem:[#allocation7 + $0x8] sm:$0xff] %v127_v19 }
  0xef   :  { %206 = shalt.err (!%p203_p0)
}
  0xf0   :  { %141 = dma.vmem_to_hbm [thread:$0]  %s139_s1, 256, %s253_s2, [#allocation4]  }
  0xf1   :  { %219 = dma.done.wait [#allocation4], 256  }
  0xf2   :  { %220 = vsyncadd [#allocation4], 4294967040 }
  0xf3   :  { %145 = vsyncpa [#allocation3], 1 }
  0xf4   :  { %146 = vsyncpa [#allocation6], 1 }
  0xf5   :  { %147 = vsyncpa [#allocation4], 1 }

</bundles_post_ra>
